<compile_context>
chip_gen: v6e
topology: v6e:2x2x1
jax: 0.10.0
libtpu: 0.0.40
codegen_flags: <defaults>
</compile_context>

<pallas_src>
import functools

import jax
import jax.numpy as jnp
from jax.experimental import pallas as pl
from jax.experimental.pallas import tpu as pltpu

_LANE = 128
_TILE_BYTES = 4 * 1024 * 1024  # per-operand block budget (safe on v7x 64 MiB VMEM)


# ---------------------------------------------------------------------------
# Pallas kernel: elementwise scale of the incoming gradient (backward pass).
# ---------------------------------------------------------------------------
def _scale_kernel(g_ref, o_ref, *, alpha):
    # Multiply in f32 (exact for f32 grads; safe/cheap upcast for bf16 on v5e
    # which lacks bf16 VALU), cast back to the gradient dtype on store.
    o_ref[...] = (g_ref[...] * jnp.float32(alpha)).astype(o_ref.dtype)


def _scale_2d(g2d, alpha):
    """Run the tiled scale kernel on a (rows, width) slab (width % 128 == 0)."""
    rows, width = g2d.shape
    itemsize = jnp.dtype(g2d.dtype).itemsize

    # Largest tile that keeps one block <= ~4 MiB; multiple of 8 rows unless
    # a single block already covers the full row extent (full-extent is legal
    # regardless of (8,128) divisibility).
    max_rows = max(8, _TILE_BYTES // (width * itemsize))
    if rows <= max_rows:
        tile_rows = rows
    else:
        tile_rows = (max_rows // 8) * 8

    grid = (pl.cdiv(rows, tile_rows),)

    return pl.pallas_call(
        functools.partial(_scale_kernel, alpha=float(alpha)),
        out_shape=jax.ShapeDtypeStruct((rows, width), g2d.dtype),
        grid_spec=pltpu.PrefetchScalarGridSpec(
            num_scalar_prefetch=0,
            grid=grid,
            in_specs=[pl.BlockSpec((tile_rows, width), lambda i: (i, 0))],
            out_specs=pl.BlockSpec((tile_rows, width), lambda i: (i, 0)),
        ),
        # Elementwise, block i -> block i: safe to reuse the input HBM buffer.
        input_output_aliases={0: 0},
        compiler_params=pltpu.CompilerParams(
            dimension_semantics=("parallel",)),
    )(g2d)


def _scale_grad(g, alpha):
    """Scale an arbitrarily-shaped gradient by alpha using the Pallas kernel."""
    n = g.size
    shape, dtype = g.shape, g.dtype

    # Prefer a wide lane-dense view (free reshape, no data movement).
    width = None
    for w in (1024, 512, 256, _LANE):
        if n % w == 0:
            width = w
            break

    if width is not None:
        rows = n // width
        out = _scale_2d(g.reshape(rows, width), alpha)
        return out.reshape(shape)

    # Rare ragged fallback: pad the flat gradient to a multiple of 128 lanes.
    rows = pl.cdiv(n, _LANE)
    pad = rows * _LANE - n
    flat = jnp.pad(g.reshape(-1), (0, pad)).reshape(rows, _LANE)
    out = _scale_2d(flat, alpha)
    return out.reshape(-1)[:n].reshape(shape).astype(dtype)


# ---------------------------------------------------------------------------
# GradientScaler: identity forward, gradient scaled by alpha in backward.
# ---------------------------------------------------------------------------
@functools.partial(jax.custom_vjp, nondiff_argnums=(1,))
def gradient_scaler(x, alpha=1.0):
    # Forward is the identity: no kernel, no HBM traffic.
    return x


def _gs_fwd(x, alpha):
    return x, None


def _gs_bwd(alpha, _, g):
    return (_scale_grad(g, alpha),)


gradient_scaler.defvjp(_gs_fwd, _gs_bwd)


class GradientScaler:
    """JAX/Pallas port of ldm.util.GradientScaler (no parameters)."""

    def __init__(self, alpha=1.0):
        self._alpha = float(alpha)

    def __call__(self, x):
        return gradient_scaler(x, self._alpha)


# ---------------------------------------------------------------------------
if __name__ == "__main__":
    key = jax.random.PRNGKey(0)
    # layout: NCHW, matching the PyTorch module's expected conv-style input.
    x = jax.random.normal(key, (2, 4, 16, 16), dtype=jnp.float32)

    module = GradientScaler(alpha=0.5)

    # Forward: identity (no-op, no kernel).
    y = module(x)
    y = jax.block_until_ready(y)
    assert y.shape == x.shape and y.dtype == x.dtype
    assert bool(jnp.allclose(y, x)), "forward is not identity"

    # Backward: gradient scaled by alpha (checked via grad of sum).
    loss_fn = lambda inp: jnp.sum(module(inp))
    g = jax.grad(loss_fn)(x)
    g = jax.block_until_ready(g)
    assert bool(jnp.allclose(g, jnp.full_like(x, 0.5))), "backward scaling wrong"

    # Also exercise the ragged (non-128-divisible) fallback path.
    x_odd = jax.random.normal(jax.random.PRNGKey(1), (3, 5, 7), dtype=jnp.float32)
    g_odd = jax.grad(lambda inp: jnp.sum(module(inp)))(x_odd)
    g_odd = jax.block_until_ready(g_odd)
    assert bool(jnp.allclose(g_odd, jnp.full_like(x_odd, 0.5))), "ragged path wrong"

    print("KERNEL_OK")
</pallas_src>

<mosaic_0001>
module attributes {stable_mosaic.version = 11 : i64} {
  func.func @_scale_kernel(%arg0: i32, %arg1: memref<2x1024xf32, #tpu.memory_space<vmem>>, %arg2: memref<2x1024xf32, #tpu.memory_space<vmem>>) attributes {dimension_semantics = [#tpu.dimension_semantics<parallel>], iteration_bounds = array<i64: 1>, scalar_prefetch = 0 : i64, scratch_operands = 0 : i64, tpu.core_type = #tpu.core_type<tc>, window_params = [{transform_indices = @transform_0, window_bounds = array<i64: 2, 1024>}, {transform_indices = @transform_1, window_bounds = array<i64: 2, 1024>}]} {
    %c0 = arith.constant 0 : index
    %c0_0 = arith.constant 0 : index
    %0 = vector.load %arg1[%c0, %c0_0] : memref<2x1024xf32, #tpu.memory_space<vmem>>, vector<2x1024xf32>
    %cst = arith.constant 5.000000e-01 : f32
    %1 = vector.broadcast %cst : f32 to vector<2x1024xf32>
    %2 = arith.mulf %0, %1 : vector<2x1024xf32>
    %c0_1 = arith.constant 0 : index
    %c0_2 = arith.constant 0 : index
    %3 = vector.load %arg2[%c0_1, %c0_2] : memref<2x1024xf32, #tpu.memory_space<vmem>>, vector<2x1024xf32>
    tpu.vector_store %arg2[%c0_1, %c0_2], %2 {strides = array<i32>} : memref<2x1024xf32, #tpu.memory_space<vmem>>, vector<2x1024xf32>,
    return
  }
  func.func @transform_0(%arg0: i32) -> (i32, i32) {
    %c0_i32 = arith.constant 0 : i32
    %c0_i32_0 = arith.constant 0 : i32
    return %arg0, %c0_i32 : i32, i32
  }
  func.func @transform_1(%arg0: i32) -> (i32, i32) {
    %c0_i32 = arith.constant 0 : i32
    %c0_i32_0 = arith.constant 0 : i32
    return %arg0, %c0_i32 : i32, i32
  }
}

</mosaic_0001>

<bundles_post_ra>
// kernel: tpu_custom_call.1
= control target key start
LH: loop header
LB: loop body
LE: loop exit
PB: predicated region body
PF: predicated region fallthrough
CT: control target
= control target key end

     0   :  { %6 = vsyncpa [#allocation3], 0  ;;  %s106_s0 = inlined_call_operand.hbm [shape: f32[2,1024], index: 0, kind: input, shape index: {}, may-alias: {0,1}]   ;;  %s107_s1 = inlined_call_operand.hbm [shape: f32[2,1024], index: 1, kind: output, shape index: {}, may-alias: {0,1}]  }
   0x1   :  { %7 = vsyncpa [#allocation4], 0  ;;  %s88_s6 = smov [#allocation2]  }
   0x2   :  { %s14_s7 = sshll.u32 %s88_s6, 4  ;;  %s15_s7 = int_to_ptr.vmem [resolvable:$true] %s14_s7 }
   0x3   :  { %s52_s8 = scalar_lea.vmem %s15_s7, 256  ;;  %p57_p1 = scmp.lt.s32.totalorder %s15_s7, %s15_s7 }
   0x4   :  { %p53_p0 = scmp.ne.s32.totalorder %s15_s7, %s52_s8  ;;  %p58_p2 = scmp.lt.s32.totalorder %s52_s8, %s52_s8 }
   0x6   :  { %p59_p3 = por %p58_p2, %p57_p1 }
   0x8   :  { %p60_p4 = pnand %p59_p3, %p53_p0 }
   0xa   :  { %63 = shalt.err (!%p60_p4)
}
   0xb   :  { %17 = dma.hbm_to_vmem [thread:$0]  %s106_s0, 256, %s15_s7, [#allocation3]  }
   0xc   :  { %84 = dma.done.wait [#allocation3], 256  }
   0xd   :  { %85 = vsyncadd [#allocation3], 4294967040  ;;  %s89_s11 = smov [#allocation5]   ;;  %v21_v0 = vld [vmem:[#allocation2] sm:$0xff]  ;;  %v22_v1 = vld [vmem:[#allocation2 + $0x8] sm:$0xff] }
   0xe   :  { %s33_s12 = sshll.u32 %s89_s11, 4  ;;  %v23_v2 = vmul.f32 0.5, %v21_v0  ;;  %v24_v3 = vmul.f32 0.5, %v22_v1  ;;  %s34_s12 = int_to_ptr.vmem [resolvable:$true] %s33_s12 }
   0xf   :  { %s64_s13 = scalar_lea.vmem %s34_s12, 256  ;;  %p69_p6 = scmp.lt.s32.totalorder %s34_s12, %s34_s12 }
  0x10   :  { %25 = vst [vmem:[#allocation5] sm:$0xff] %v23_v2  ;;  %26 = vst [vmem:[#allocation5 + $0x8] sm:$0xff] %v24_v3  ;;  %p65_p5 = scmp.ne.s32.totalorder %s34_s12, %s64_s13  ;;  %p70_p7 = scmp.lt.s32.totalorder %s64_s13, %s64_s13 }
  0x12   :  { %p71_p8 = por %p70_p7, %p69_p6 }
  0x14   :  { %p72_p9 = pnand %p71_p8, %p65_p5 }
  0x16   :  { %75 = shalt.err (!%p72_p9)
}
  0x17   :  { %36 = dma.vmem_to_hbm [thread:$0]  %s34_s12, 256, %s107_s1, [#allocation4]  }
  0x18   :  { %86 = dma.done.wait [#allocation4], 256  }
  0x19   :  { %87 = vsyncadd [#allocation4], 4294967040 }
  0x1a   :  { %40 = vsyncpa [#allocation3], 1 }
  0x1b   :  { %41 = vsyncpa [#allocation4], 1 }

</bundles_post_ra>
